<compile_context>
chip_gen: v6e
topology: v6e:2x2x1
jax: 0.10.0
libtpu: 0.0.40
codegen_flags: <defaults>
</compile_context>

<pallas_src>
import functools

import jax
import jax.numpy as jnp
from jax.experimental import pallas as pl
from jax.experimental.pallas import tpu as pltpu


def _round_up(x, m):
    return (x + m - 1) // m * m


def _attn_subset_kernel(p_ref, w_ref, b_ref, o_ref, *, n_valid, n_pad):
    # p_ref: (1, C, N_pad)   current batch's (zero-padded) points
    # w_ref: (S_pad, C)      conv1d weight (kernel_size=1 squeezed, zero-padded rows)
    # b_ref: (S_pad, 1)      conv1d bias (kept 2D for TPU layout)
    # o_ref: (1, C, S_pad)   lane-dense output block
    p = p_ref[0].astype(jnp.bfloat16)            # (C, N_pad)  bf16 MXU operand
    w = w_ref[...].astype(jnp.bfloat16)          # (S_pad, C)  bf16 MXU operand
    b = b_ref[...].astype(jnp.float32)           # (S_pad, 1)

    # 1x1 Conv1d == matmul over channels: logits[s, n] = sum_c W[s, c] * p[c, n] + b[s]
    logits = jnp.dot(w, p, preferred_element_type=jnp.float32) + b   # (S_pad, N_pad) f32

    # Mask padded point columns so they receive zero probability mass.
    if n_pad != n_valid:
        col = jax.lax.broadcasted_iota(jnp.int32, logits.shape, 1)
        logits = jnp.where(col < n_valid, logits, jnp.float32(-1e30))

    # softmax over N (dim=2 in the PyTorch (B, S, N) tensor), in f32.
    logits = logits - jnp.max(logits, axis=-1, keepdims=True)
    e = jnp.exp(logits)
    inv = pl.reciprocal(jnp.sum(e, axis=-1, keepdims=True), approx=True)
    probs = (e * inv).astype(jnp.bfloat16)       # (S_pad, N_pad)

    # points @ softmax(...)^T without materializing the transpose:
    # contract the N axis of both operands -> (C, S_pad), f32 accumulation.
    out = jax.lax.dot_general(
        p, probs,
        dimension_numbers=(((1,), (1,)), ((), ())),
        preferred_element_type=jnp.float32,
    )
    o_ref[0] = out.astype(o_ref.dtype)


def attention_subset_sampling(points, conv_w, conv_b):
    """points: (B, C, N), conv_w: (S, C), conv_b: (S,). Returns (B, C, S)."""
    B, C, N = points.shape
    S = conv_w.shape[0]

    n_pad = _round_up(N, 128)
    s_pad = _round_up(S, 128)

    points_p = points
    if n_pad != N:
        points_p = jnp.pad(points, ((0, 0), (0, 0), (0, n_pad - N)))

    w_p, b_p = conv_w, conv_b
    if s_pad != S:
        w_p = jnp.pad(conv_w, ((0, s_pad - S), (0, 0)))
        b_p = jnp.pad(conv_b, ((0, s_pad - S),))
    bias2d = b_p.reshape(s_pad, 1).astype(jnp.float32)

    kernel = functools.partial(_attn_subset_kernel, n_valid=N, n_pad=n_pad)

    out_pad = pl.pallas_call(
        kernel,
        out_shape=jax.ShapeDtypeStruct((B, C, s_pad), points.dtype),
        grid_spec=pltpu.PrefetchScalarGridSpec(
            num_scalar_prefetch=0,
            grid=(B,),
            in_specs=[
                pl.BlockSpec((1, C, n_pad), lambda b: (b, 0, 0)),
                pl.BlockSpec((s_pad, C), lambda b: (0, 0)),
                pl.BlockSpec((s_pad, 1), lambda b: (0, 0)),
            ],
            out_specs=pl.BlockSpec((1, C, s_pad), lambda b: (b, 0, 0)),
        ),
        compiler_params=pltpu.CompilerParams(
            dimension_semantics=("parallel",),
            vmem_limit_bytes=32 * 1024 * 1024,
        ),
    )(points_p, w_p, bias2d)

    # Drop the padded sample columns -> (B, C, S).
    return out_pad[:, :, :S]


def _reference(points, conv_w, conv_b):
    # pure-JAX f32 reference of the PyTorch forward
    logits = jnp.einsum("sc,bcn->bsn", conv_w, points) + conv_b[None, :, None]
    probs = jax.nn.softmax(logits, axis=2)            # (B, S, N)
    weight = jnp.transpose(probs, (0, 2, 1))           # (B, N, S)
    return jnp.matmul(points, weight)                  # (B, C, S)


if __name__ == "__main__":
    key = jax.random.PRNGKey(0)
    k_pts, k_w, k_b = jax.random.split(key, 3)

    B, C, N = 2, 32, 64          # batch, input_dim (channels), num points
    S = 16                       # num_sample

    points = jax.random.normal(k_pts, (B, C, N), dtype=jnp.float32)

    # Deterministic Conv1d(C, S, kernel_size=1) params (synthetic init).
    fan_in = C
    bound = 1.0 / (fan_in ** 0.5)
    conv_w = jax.random.uniform(k_w, (S, C), minval=-bound, maxval=bound,
                                dtype=jnp.float32)
    conv_b = jax.random.uniform(k_b, (S,), minval=-bound, maxval=bound,
                                dtype=jnp.float32)

    out = attention_subset_sampling(points, conv_w, conv_b)
    out = jax.block_until_ready(out)

    ref = _reference(points, conv_w, conv_b)
    assert out.shape == (B, C, S)
    # Tolerance loosened for bf16 MXU operands + approx reciprocal.
    assert jnp.allclose(out, ref, atol=5e-2, rtol=5e-2)

    print("KERNEL_OK")
</pallas_src>

<mosaic_0001>
module attributes {stable_mosaic.version = 11 : i64} {
  func.func @_attn_subset_kernel(%arg0: i32, %arg1: memref<1x32x128xf32, #tpu.memory_space<vmem>>, %arg2: memref<128x32xf32, #tpu.memory_space<vmem>>, %arg3: memref<128x1xf32, #tpu.memory_space<vmem>>, %arg4: memref<1x32x128xf32, #tpu.memory_space<vmem>>) attributes {dimension_semantics = [#tpu.dimension_semantics<parallel>], iteration_bounds = array<i64: 2>, scalar_prefetch = 0 : i64, scratch_operands = 0 : i64, tpu.core_type = #tpu.core_type<tc>, window_params = [{transform_indices = @transform_0, window_bounds = array<i64: 1, 32, 128>}, {pipeline_mode = #tpu.pipeline_mode<synchronous>, transform_indices = @transform_1, window_bounds = array<i64: 128, 32>}, {pipeline_mode = #tpu.pipeline_mode<synchronous>, transform_indices = @transform_2, window_bounds = array<i64: 128, 1>}, {transform_indices = @transform_3, window_bounds = array<i64: 1, 32, 128>}]} {
    %c0 = arith.constant 0 : index
    %c0_0 = arith.constant 0 : index
    %c0_1 = arith.constant 0 : index
    %0 = vector.load %arg1[%c0, %c0_0, %c0_1] : memref<1x32x128xf32, #tpu.memory_space<vmem>>, vector<1x32x128xf32>
    %1 = vector.shape_cast %0 : vector<1x32x128xf32> to vector<32x128xf32>
    %2 = arith.truncf %1 : vector<32x128xf32> to vector<32x128xbf16>
    %c0_2 = arith.constant 0 : index
    %c0_3 = arith.constant 0 : index
    %3 = vector.load %arg2[%c0_2, %c0_3] : memref<128x32xf32, #tpu.memory_space<vmem>>, vector<128x32xf32>
    %4 = arith.truncf %3 : vector<128x32xf32> to vector<128x32xbf16>
    %c0_4 = arith.constant 0 : index
    %c0_5 = arith.constant 0 : index
    %5 = vector.load %arg3[%c0_4, %c0_5] : memref<128x1xf32, #tpu.memory_space<vmem>>, vector<128x1xf32>
    %cst = arith.constant dense<0.000000e+00> : vector<128x128xf32>
    %6 = tpu.matmul %4, %2, %cst {dimension_numbers = #tpu.dot_dimension_numbers<[1], [0], [0], [1], [0, 0, 1, 1], [], []>} : vector<128x32xbf16>, vector<32x128xbf16>, vector<128x128xf32> -> vector<128x128xf32>
    %7 = vector.broadcast %5 : vector<128x1xf32> to vector<128x128xf32>
    %8 = arith.addf %6, %7 : vector<128x128xf32>
    %9 = tpu.iota {dimensions = array<i32: 1>} : vector<128x128xi32>
    %c64_i32 = arith.constant 64 : i32
    %10 = vector.broadcast %c64_i32 : i32 to vector<128x128xi32>
    %11 = arith.cmpi slt, %9, %10 : vector<128x128xi32>
    %cst_6 = arith.constant -1.000000e+30 : f32
    %12 = vector.broadcast %cst_6 : f32 to vector<128x128xf32>
    %13 = arith.select %11, %8, %12 : vector<128x128xi1>, vector<128x128xf32>
    %cst_7 = arith.constant dense<0xFF800000> : vector<128xf32>
    %14 = vector.multi_reduction <maximumf>, %13, %cst_7 [1] : vector<128x128xf32> to vector<128xf32>
    %15 = vector.shape_cast %14 : vector<128xf32> to vector<128x1xf32>
    %16 = vector.broadcast %15 : vector<128x1xf32> to vector<128x128xf32>
    %17 = arith.subf %13, %16 : vector<128x128xf32>
    %18 = math.exp %17 : vector<128x128xf32>
    %cst_8 = arith.constant dense<0.000000e+00> : vector<128xf32>
    %19 = vector.multi_reduction <add>, %18, %cst_8 [1] : vector<128x128xf32> to vector<128xf32>
    %20 = vector.shape_cast %19 : vector<128xf32> to vector<128x1xf32>
    %21 = tpu.reciprocal %20 {approx = true} : vector<128x1xf32> -> vector<128x1xf32>
    %22 = vector.broadcast %21 : vector<128x1xf32> to vector<128x128xf32>
    %23 = arith.mulf %18, %22 : vector<128x128xf32>
    %24 = arith.truncf %23 : vector<128x128xf32> to vector<128x128xbf16>
    %cst_9 = arith.constant dense<0.000000e+00> : vector<32x128xf32>
    %25 = tpu.matmul %2, %24, %cst_9 {dimension_numbers = #tpu.dot_dimension_numbers<[1], [1], [0], [0], [0, 0, 1, 0], [], []>} : vector<32x128xbf16>, vector<128x128xbf16>, vector<32x128xf32> -> vector<32x128xf32>
    %c0_10 = arith.constant 0 : index
    %c0_11 = arith.constant 0 : index
    %c0_12 = arith.constant 0 : index
    %26 = vector.load %arg4[%c0_10, %c0_11, %c0_12] : memref<1x32x128xf32, #tpu.memory_space<vmem>>, vector<1x32x128xf32>
    %27 = vector.shape_cast %26 : vector<1x32x128xf32> to vector<32x128xf32>
    %28 = vector.shape_cast %25 : vector<32x128xf32> to vector<1x32x128xf32>
    tpu.vector_store %arg4[%c0_10, %c0_11, %c0_12], %28 {strides = array<i32>} : memref<1x32x128xf32, #tpu.memory_space<vmem>>, vector<1x32x128xf32>,
    return
  }
  func.func @transform_0(%arg0: i32) -> (i32, i32, i32) {
    %c0_i32 = arith.constant 0 : i32
    %c0_i32_0 = arith.constant 0 : i32
    %c0_i32_1 = arith.constant 0 : i32
    return %arg0, %c0_i32, %c0_i32_0 : i32, i32, i32
  }
  func.func @transform_1(%arg0: i32) -> (i32, i32) {
    %c0_i32 = arith.constant 0 : i32
    %c0_i32_0 = arith.constant 0 : i32
    %c0_i32_1 = arith.constant 0 : i32
    return %c0_i32, %c0_i32_0 : i32, i32
  }
  func.func @transform_2(%arg0: i32) -> (i32, i32) {
    %c0_i32 = arith.constant 0 : i32
    %c0_i32_0 = arith.constant 0 : i32
    %c0_i32_1 = arith.constant 0 : i32
    return %c0_i32, %c0_i32_0 : i32, i32
  }
  func.func @transform_3(%arg0: i32) -> (i32, i32, i32) {
    %c0_i32 = arith.constant 0 : i32
    %c0_i32_0 = arith.constant 0 : i32
    %c0_i32_1 = arith.constant 0 : i32
    return %arg0, %c0_i32, %c0_i32_0 : i32, i32, i32
  }
}

</mosaic_0001>

<bundles_post_ra>
// kernel: tpu_custom_call.1
= control target key start
LH: loop header
LB: loop body
LE: loop exit
PB: predicated region body
PF: predicated region fallthrough
CT: control target
= control target key end

     0   :  { %8 = vsyncpa [#allocation3], 0  ;;  %s1341_s0 = inlined_call_operand.vmem [shape: f32[2,32,128], index: 0, kind: input, shape index: {}]   ;;  %s1342_s1 = inlined_call_operand.vmem [shape: f32[128,32], index: 1, kind: input, shape index: {}]   ;;  %s1343_s2 = inlined_call_operand.vmem [shape: f32[128,1], index: 2, kind: input, shape index: {}]   ;;  %s1344_s3 = inlined_call_operand.hbm [shape: f32[2,32,128], index: 3, kind: output, shape index: {}]  }
   0x1   :  { %10 = vsyncpa [#allocation3 + $0x1], 0  ;;  %s994_s12 = smov 0   ;;  %s996_s13 = smov 0  }
   0x2   :  { %s998_s14 = smov 0   ;;  %s1000_s15 = smov 0  }
   0x3 LB: > { %s1015_s16 = sadd.s32 4294967295, %s968_s15   ;;  %s718_s17 = sadd.s32 4294967294, %s968_s15   ;;  %s968_s15 = sphi %s1000_s15, %s1350_s15   ;;  %s964_s14 = sphi %s998_s14, %s1349_s14   ;;  %s960_s13 = sphi %s996_s13, %s1348_s13   ;;  %s956_s12 = sphi %s994_s12, %s1347_s12  }
   0x4   : > { %s1019_s18 = sadd.s32 1, %s968_s15   ;;  %s91_s19 = sadd.s32 1, %s964_s14 }
   0x5   : > { %s88_s20 = ssub.s32 %s968_s15, %s1019_s18  ;;  %p101_p0 = scmp.ne.s32.totalorder %s964_s14, %s960_s13 }
   0x6   : > { %p89_p1 = scmp.eq.s32.totalorder %s88_s20, 0  ;;  %p102_p2 = scmp.eq.s32.totalorder %s1015_s16, 1 }
   0x7   : > { %p107_p3 = scmp.ne.s32.totalorder %s960_s13, %s956_s12  ;;  %p108_p4 = scmp.eq.s32.totalorder %s718_s17, 1 }
   0x8   : > { %s1030_s21 = scalar_select %p89_p1, %s964_s14, %s91_s19  }
   0x9   : > { %p1032_p5 = por %p102_p2, %p101_p0  ;;  %p1036_p6 = por %p108_p4, %p107_p3 }
   0xa   : > { %p721_p7 = scmp.ge.s32.totalorder %s968_s15, 1  ;;  %p140_p8 = scmp.lt.s32.totalorder %s968_s15, 3 }
   0xc   : > { %p141_p9 = pnand %p721_p7, %p140_p8 }
   0xd   : > { %p164_p10 = scmp.lt.s32.totalorder (!%p141_p9), %s1015_s16, 1  ;;  %s161_s17 = sand.u32 (!%p141_p9), 1, %s960_s13  }
   0xe   : > { %144 = sbr.rel (%p141_p9) target bundleno = 847 (0x34f), region = 32  ;;  %s722_s19 = sshll.u32 (!%p141_p9), %s161_s17, 5 }
   0xf   : > { %s163_s20 = scalar_lea.vmem (!%p141_p9), [#allocation2], %s722_s19  ;;  %s739_s25 = sshll.u32 (!%p141_p9), %s1015_s16, 9 }
  0x10   : > { %s656_s24 = sshll.u32 (!%p141_p9), %s163_s20, 4  ;;  %s1294_s24 = int_to_ptr.vmem [resolvable:$true] %s656_s24 }
  0x11   : > { %s908_s30 = scalar_lea.vmem (!%p141_p9), %s1294_s24, 512 }
  0x12   : > { %p909_p11 = scmp.ne.s32.totalorder (!%p141_p9), %s1294_s24, %s908_s30 }
  0x13   : > { %v176_v0 = vld [vmem:[%s1342_s1] sm:$0xff]  ;;  %v177_v1 = vld [vmem:[%s1342_s1 + $0x8] sm:$0xff]  ;;  %vm296_vm0 = vcmask 261120   ;;  %v970_v3 = vmov 0   ;;  %s165_s28 = scalar_select %p164_p10, %s1015_s16, 1  ;;  %v214_v4 = vld [vmem:[%s1343_s2 + $0x70] sm:$0xff]  ;;  %v418_v62 = vlaneseq }
  0x14   : > { %v192_v2 = vpack.c.bf16 %v177_v1, %v176_v0  ;;  %842 = vset.pattern.permute.xlu0 %v970_v3  ;;  %843 = vset.pattern.permute.xlu1 %v970_v3  ;;  %v215_v10 = vld [vmem:[%s1343_s2 + $0x78] sm:$0xff]  ;;  %v212_v11 = vld [vmem:[%s1343_s2 + $0x60] sm:$0xff]  ;;  %v213_v13 = vld [vmem:[%s1343_s2 + $0x68] sm:$0xff]  ;;  %p910_p12 = pnand %p909_p11, %p1032_p5  ;;  %s971_s16 = smov [#allocation2]  }
  0x15   : > { %s738_s29 = sshll.u32 %s165_s28, 5  ;;  %288 = vperm.xlu0 %842, %v214_v4   ;;  %278 = vperm.xlu1 %843, %v212_v11   ;;  %v178_v14 = vld [vmem:[%s1342_s1 + $0x10] sm:$0xff]  ;;  %v179_v15 = vld [vmem:[%s1342_s1 + $0x18] sm:$0xff]  ;;  %v180_v16 = vld [vmem:[%s1342_s1 + $0x20] sm:$0xff]  ;;  %s1299_s28 = scalar_lea.hbm %s1344_s3, %s739_s25 }
  0x16   : > { %764 = vmatprep.mubr.msk.bf16.mxu0 %vm296_vm0, %v192_v2  ;;  %s168_s5 = scalar_lea.vmem %s1341_s0, %s738_s29  ;;  %v181_v17 = vld [vmem:[%s1342_s1 + $0x28] sm:$0xff]  ;;  %v210_v18 = vld [vmem:[%s1343_s2 + $0x50] sm:$0xff]  ;;  %v193_v19 = vpack.c.bf16 %v179_v15, %v178_v14  ;;  %v211_v20 = vld [vmem:[%s1343_s2 + $0x58] sm:$0xff]  ;;  %v1161_v2 = vand.u32 127, %v418_v62  ;;  %s1301_s29 = scalar_lea.sflag [#allocation3], %s161_s17 }
  0x17   : > { %v172_v5 = vld [vmem:[%s168_s5 + $0x10] sm:$0xff]  ;;  %v173_v6 = vld [vmem:[%s168_s5 + $0x18] sm:$0xff]  ;;  %v170_v7 = vld [vmem:[%s168_s5] sm:$0xff]  ;;  %v194_v21 = vpack.c.bf16 %v181_v17, %v180_v16  ;;  %p911_p13 = pneg %p910_p12  ;;  %s912_s4 = sshll.u32 %s971_s16, 4  ;;  %s913_s4 = int_to_ptr.vmem [resolvable:$false] %s912_s4 }
  0x18   : > { %v1057_v8 = vpack.c.bf16 %v173_v6, %v172_v5  ;;  %v171_v9 = vld [vmem:[%s168_s5 + $0x8] sm:$0xff]  ;;  %v208_v22 = vld [vmem:[%s1343_s2 + $0x40] sm:$0xff]  ;;  %v182_v24 = vld [vmem:[%s1342_s1 + $0x30] sm:$0xff]  ;;  %vm420_vm1 = vcmp.lt.s32.totalorder %v1161_v2, 64  ;;  %s914_s5 = scalar_lea.vmem %s913_s4, 1024  ;;  %p915_p0 = scmp.lt.s32.totalorder %s1294_s24, %s913_s4 }
  0x19   : > { %v174_v12 = vpack.c.bf16 %v171_v9, %v170_v7  ;;  %293 = vperm.xlu0 %842, %v215_v10   ;;  %283 = vperm.xlu1 %843, %v213_v13   ;;  %v209_v23 = vld [vmem:[%s1343_s2 + $0x48] sm:$0xff]  ;;  %v183_v25 = vld [vmem:[%s1342_s1 + $0x38] sm:$0xff]  ;;  %v184_v26 = vld [vmem:[%s1342_s1 + $0x40] sm:$0xff]  ;;  %p916_p1 = scmp.lt.s32.totalorder %s914_s5, %s908_s30 }
  0x1a   : > { %760 = vmatprep.subr.bf16.mxu0 %v1057_v8  ;;  %v185_v27 = vld [vmem:[%s1342_s1 + $0x48] sm:$0xff]  ;;  %v206_v28 = vld [vmem:[%s1343_s2 + $0x30] sm:$0xff]  ;;  %v195_v29 = vpack.c.bf16 %v183_v25, %v182_v24  ;;  %v207_v30 = vld [vmem:[%s1343_s2 + $0x38] sm:$0xff] }
  0x1b   : > { %761 = vmatpush3.bf16.msra.mxu0 %v1057_v8  ;;  %796 = vmatprep.mubr.bf16.mxu1 %v174_v12  ;;  %v196_v31 = vpack.c.bf16 %v185_v27, %v184_v26  ;;  %v204_v32 = vld [vmem:[%s1343_s2 + $0x20] sm:$0xff]  ;;  %v205_v33 = vld [vmem:[%s1343_s2 + $0x28] sm:$0xff]  ;;  %v186_v34 = vld [vmem:[%s1342_s1 + $0x50] sm:$0xff]  ;;  %p917_p2 = por %p916_p1, %p915_p0 }
  0x1c   : > { %762 = vmatprep.subr.bf16.mxu0 %v174_v12  ;;  %v187_v35 = vld [vmem:[%s1342_s1 + $0x58] sm:$0xff]  ;;  %v188_v36 = vld [vmem:[%s1342_s1 + $0x60] sm:$0xff]  ;;  %v189_v37 = vld [vmem:[%s1342_s1 + $0x68] sm:$0xff] }
  0x1d   : > { %268 = vperm.xlu0 %842, %v210_v18   ;;  %273 = vperm.xlu1 %843, %v211_v20   ;;  %v202_v38 = vld [vmem:[%s1343_s2 + $0x10] sm:$0xff]  ;;  %v197_v39 = vpack.c.bf16 %v187_v35, %v186_v34  ;;  %v203_v40 = vld [vmem:[%s1343_s2 + $0x18] sm:$0xff]  ;;  %v198_v41 = vpack.c.bf16 %v189_v37, %v188_v36  ;;  %v200_v42 = vld [vmem:[%s1343_s2] sm:$0xff]  ;;  %p918_p3 = pnand %p917_p2, %p911_p13 }
  0x1e   : > { %v201_v43 = vld [vmem:[%s1343_s2 + $0x8] sm:$0xff]  ;;  %v190_v44 = vld [vmem:[%s1342_s1 + $0x70] sm:$0xff]  ;;  %v191_v45 = vld [vmem:[%s1342_s1 + $0x78] sm:$0xff] }
  0x1f   : > { %763 = vmatpush3.bf16.msra.mxu0 %v174_v12  ;;  %v199_v46 = vpack.c.bf16 %v191_v45, %v190_v44 }
  0x21   : > { %258 = vperm.xlu0 %842, %v208_v22   ;;  %263 = vperm.xlu1 %843, %v209_v23  }
  0x22   : > { %765 = vmatmul.mubr.msk.bf16.vlgmr.msra.gmra.mxu0 %vm296_vm0, %v193_v19 }
  0x23   : > { %768 = vmatprep.mubr.msk.bf16.mxu0 %vm296_vm0, %v194_v21 }
  0x25   : > { %248 = vperm.xlu0 %842, %v206_v28   ;;  %253 = vperm.xlu1 %843, %v207_v30  }
  0x29   : > { %238 = vperm.xlu0 %842, %v204_v32   ;;  %243 = vperm.xlu1 %843, %v205_v33  }
  0x2a   : > { %769 = vmatmul.mubr.msk.bf16.gmra.mxu0 %vm296_vm0, %v195_v29 }
  0x2b   : > { %772 = vmatprep.mubr.msk.bf16.mxu0 %vm296_vm0, %v196_v31 }
  0x2d   : > { %228 = vperm.xlu0 %842, %v202_v38   ;;  %233 = vperm.xlu1 %843, %v203_v40  }
  0x31   : > { %218 = vperm.xlu0 %842, %v200_v42   ;;  %223 = vperm.xlu1 %843, %v201_v43  }
  0x32   : > { %773 = vmatmul.mubr.msk.bf16.gmra.mxu0 %vm296_vm0, %v197_v39 }
  0x33   : > { %776 = vmatprep.mubr.msk.bf16.mxu0 %vm296_vm0, %v198_v41 }
  0x3a   : > { %777 = vmatmul.mubr.msk.bf16.gmra.mxu0 %vm296_vm0, %v199_v46 }
  0x90   : > { %v289_v50 = vpop.permute.xlu0 %288  ;;  %v279_v53 = vpop.permute.xlu1 %278 }
  0x94   : > { %v294_v55 = vpop.permute.xlu0 %293  ;;  %v284_v58 = vpop.permute.xlu1 %283 }
  0x98   : > { %v269_v60 = vpop.permute.xlu0 %268  ;;  %v274_v0 = vpop.permute.xlu1 %273 }
  0x9c   : > { %v259_v3 = vpop.permute.xlu0 %258  ;;  %v264_v10 = vpop.permute.xlu1 %263 }
  0xa0   : > { %v249_v13 = vpop.permute.xlu0 %248  ;;  %v254_v19 = vpop.permute.xlu1 %253 }
  0xa4   : > { %v239_v24 = vpop.permute.xlu0 %238  ;;  %v244_v29 = vpop.permute.xlu1 %243 }
  0xa8   : > { %v229_v30 = vpop.permute.xlu0 %228  ;;  %v234_v35 = vpop.permute.xlu1 %233 }
  0xac   : > { %v219_v40 = vpop.permute.xlu0 %218  ;;  %v224_v45 = vpop.permute.xlu1 %223 }
  0xe2   : > { %v766_v47 = vpop.f32.mrf.mxu0 }
  0xe3   : > { %v364_v36 = vadd.f32 %v766_v47, %v229_v30 }
  0xe4   : > { %v1155_v48 = vpop.f32.mrf.mxu0 }
  0xe5   : > { %v356_v41 = vadd.f32 %v1155_v48, %v219_v40  ;;  %v1200_v44 = vsel %vm420_vm1, %v364_v36, -1e+30 }
  0xe6   : > { %v1157_v49 = vpop.f32.mrf.mxu0 }
  0xe7   : > { %v367_v42 = vadd.f32 %v1157_v49, %v234_v35  ;;  %v1211_v48 = vsel %vm420_vm1, %v356_v41, -1e+30 }
  0xe8   : > { %v1159_v51 = vpop.f32.mrf.mxu0 }
  0xe9   : > { %v359_v46 = vadd.f32 %v1159_v51, %v224_v45  ;;  %v1207_v47 = vsel %vm420_vm1, %v367_v42, -1e+30 }
  0xea   : > { %v770_v52 = vpop.f32.mrf.mxu0 }
  0xeb   : > { %v380_v25 = vadd.f32 %v770_v52, %v249_v13  ;;  %v1217_v49 = vsel %vm420_vm1, %v359_v46, -1e+30 }
  0xec   : > { %v371_v54 = vpop.f32.mrf.mxu0 }
  0xed   : > { %v372_v31 = vadd.f32 %v371_v54, %v239_v24  ;;  %v427_v34 = vsel %vm420_vm1, %v380_v25, -1e+30 }
  0xee   : > { %v771_v56 = vpop.f32.mrf.mxu0 }
  0xef   : > { %v383_v32 = vadd.f32 %v771_v56, %v254_v19  ;;  %v1188_v39 = vsel %vm420_vm1, %v372_v31, -1e+30 }
  0xf0   : > { %v374_v57 = vpop.f32.mrf.mxu0 }
  0xf1   : > { %v375_v37 = vadd.f32 %v374_v57, %v244_v29  ;;  %v1184_v38 = vsel %vm420_vm1, %v383_v32, -1e+30 }
  0xf2   : > { %v774_v59 = vpop.f32.mrf.mxu0 }
  0xf3   : > { %v396_v15 = vadd.f32 %v774_v59, %v269_v60  ;;  %v1196_v43 = vsel %vm420_vm1, %v375_v37, -1e+30 }
  0xf4   : > { %v387_v61 = vpop.f32.mrf.mxu0 }
  0xf5   : > { %v388_v20 = vadd.f32 %v387_v61, %v259_v3  ;;  %v431_v22 = vsel %vm420_vm1, %v396_v15, -1e+30 }
  0xf6   : > { %v775_v63 = vpop.f32.mrf.mxu0 }
  0xf7   : > { %v399_v21 = vadd.f32 %v775_v63, %v274_v0  ;;  %v429_v28 = vsel %vm420_vm1, %v388_v20, -1e+30 }
  0xf8   : > { %v390_v1 = vpop.f32.mrf.mxu0 }
  0xf9   : > { %v391_v26 = vadd.f32 %v390_v1, %v264_v10  ;;  %v432_v27 = vsel %vm420_vm1, %v399_v21, -1e+30 }
  0xfa   : > { %v778_v4 = vpop.f32.mrf.mxu0 }
  0xfb   : > { %v412_v5 = vadd.f32 %v778_v4, %v289_v50  ;;  %v430_v33 = vsel %vm420_vm1, %v391_v26, -1e+30 }
  0xfc   : > { %v403_v6 = vpop.f32.mrf.mxu0 }
  0xfd   : > { %v404_v7 = vadd.f32 %v403_v6, %v279_v53  ;;  %v435_v9 = vsel %vm420_vm1, %v412_v5, -1e+30 }
  0xfe   : > { %465 = vmax.xlane.f32.xlu0 %v435_v9  ;;  %v779_v11 = vpop.f32.mrf.mxu0 }
  0xff   : > { %v415_v12 = vadd.f32 %v779_v11, %v294_v55  ;;  %v433_v18 = vsel %vm420_vm1, %v404_v7, -1e+30 }
 0x100   : > { %v406_v14 = vpop.f32.mrf.mxu0 }
 0x101   : > { %v407_v16 = vadd.f32 %v406_v14, %v284_v58  ;;  %v436_v17 = vsel %vm420_vm1, %v415_v12, -1e+30 }
 0x102   : > { %467 = vmax.xlane.f32.xlu1 %v436_v17  ;;  %461 = vmax.xlane.f32.xlu0 %v433_v18 }
 0x103   : > { %v434_v23 = vsel %vm420_vm1, %v407_v16, -1e+30 }
 0x106   : > { %457 = vmax.xlane.f32.xlu1 %v431_v22  ;;  %463 = vmax.xlane.f32.xlu0 %v434_v23 }
 0x10a   : > { %459 = vmax.xlane.f32.xlu0 %v432_v27  ;;  %453 = vmax.xlane.f32.xlu1 %v429_v28 }
 0x10e   : > { %455 = vmax.xlane.f32.xlu0 %v430_v33  ;;  %449 = vmax.xlane.f32.xlu1 %v427_v34 }
 0x112   : > { %451 = vmax.xlane.f32.xlu0 %v1184_v38  ;;  %445 = vmax.xlane.f32.xlu1 %v1188_v39 }
 0x116   : > { %447 = vmax.xlane.f32.xlu0 %v1196_v43  ;;  %441 = vmax.xlane.f32.xlu1 %v1200_v44 }
 0x11a   : > { %443 = vmax.xlane.f32.xlu0 %v1207_v47  ;;  %437 = vmax.xlane.f32.xlu1 %v1211_v48 }
 0x11e   : > { %439 = vmax.xlane.f32.xlu0 %v1217_v49 }
 0x187   : > { %v466_v50 = vpop.xlane.xlu0 %465 }
 0x188   : > { %v483_v51 = vsub.f32 %v435_v9, %v466_v50 }
 0x18a   : > { %v513_v52 = vmul.f32 1.442695, %v483_v51 }
 0x18b   : > { %v468_v53 = vpop.xlane.xlu1 %467  ;;  %v462_v54 = vpop.xlane.xlu0 %461 }
 0x18c   : > { %844 = vpow2.f32 %v513_v52  ;;  %v484_v55 = vsub.f32 %v436_v17, %v468_v53  ;;  %v481_v56 = vsub.f32 %v433_v18, %v462_v54 }
 0x18e   : > { %v515_v57 = vmul.f32 1.442695, %v484_v55  ;;  %v509_v58 = vmul.f32 1.442695, %v481_v56 }
 0x18f   : > { %v458_v59 = vpop.xlane.xlu1 %457  ;;  %v464_v60 = vpop.xlane.xlu0 %463 }
 0x190   : > { %846 = vpow2.f32 %v515_v57  ;;  %v479_v61 = vsub.f32 %v431_v22, %v458_v59  ;;  %v482_v62 = vsub.f32 %v434_v23, %v464_v60 }
 0x191   : > { %848 = vpow2.f32 %v509_v58 }
 0x192   : > { %v505_v63 = vmul.f32 1.442695, %v479_v61  ;;  %v511_v0 = vmul.f32 1.442695, %v482_v62 }
 0x193   : > { %v460_v1 = vpop.xlane.xlu0 %459  ;;  %v454_v2 = vpop.xlane.xlu1 %453 }
 0x194   : > { %850 = vpow2.f32 %v505_v63  ;;  %v480_v3 = vsub.f32 %v432_v27, %v460_v1  ;;  %v477_v4 = vsub.f32 %v429_v28, %v454_v2 }
 0x195   : > { %852 = vpow2.f32 %v511_v0 }
 0x196   : > { %v507_v5 = vmul.f32 1.442695, %v480_v3  ;;  %v501_v6 = vmul.f32 1.442695, %v477_v4 }
 0x197   : > { %v456_v7 = vpop.xlane.xlu0 %455  ;;  %v450_v9 = vpop.xlane.xlu1 %449 }
 0x198   : > { %854 = vpow2.f32 %v507_v5  ;;  %v478_v10 = vsub.f32 %v430_v33, %v456_v7  ;;  %v475_v11 = vsub.f32 %v427_v34, %v450_v9 }
 0x199   : > { %v1220_v12 = vpop.eup %844  ;;  %856 = vpow2.f32 %v501_v6 }
 0x19a   : > { %v503_v13 = vmul.f32 1.442695, %v478_v10  ;;  %v497_v14 = vmul.f32 1.442695, %v475_v11  ;;  %545 = vadd.xlane.f32.xlu1 %v1220_v12 }
 0x19b   : > { %v452_v15 = vpop.xlane.xlu0 %451  ;;  %v446_v16 = vpop.xlane.xlu1 %445 }
 0x19c   : > { %858 = vpow2.f32 %v503_v13  ;;  %v476_v17 = vsub.f32 %v1184_v38, %v452_v15  ;;  %v473_v18 = vsub.f32 %v1188_v39, %v446_v16 }
 0x19d   : > { %v1225_v19 = vpop.eup %846  ;;  %860 = vpow2.f32 %v497_v14 }
 0x19e   : > { %v1227_v20 = vpop.eup %848  ;;  %v499_v21 = vmul.f32 1.442695, %v476_v17  ;;  %v493_v22 = vmul.f32 1.442695, %v473_v18  ;;  %547 = vadd.xlane.f32.xlu0 %v1225_v19 }
 0x19f   : > { %541 = vadd.xlane.f32.xlu1 %v1227_v20  ;;  %v448_v23 = vpop.xlane.xlu0 %447  ;;  %v442_v24 = vpop.xlane.xlu1 %441 }
 0x1a0   : > { %862 = vpow2.f32 %v499_v21  ;;  %v474_v25 = vsub.f32 %v1196_v43, %v448_v23  ;;  %v471_v26 = vsub.f32 %v1200_v44, %v442_v24 }
 0x1a1   : > { %v1233_v27 = vpop.eup %850  ;;  %864 = vpow2.f32 %v493_v22 }
 0x1a2   : > { %v1235_v28 = vpop.eup %852  ;;  %v495_v29 = vmul.f32 1.442695, %v474_v25  ;;  %v489_v30 = vmul.f32 1.442695, %v471_v26 }
 0x1a3   : > { %543 = vadd.xlane.f32.xlu0 %v1235_v28  ;;  %537 = vadd.xlane.f32.xlu1 %v1233_v27  ;;  %v444_v31 = vpop.xlane.xlu0 %443  ;;  %v438_v32 = vpop.xlane.xlu1 %437 }
 0x1a4   : > { %866 = vpow2.f32 %v495_v29  ;;  %v472_v33 = vsub.f32 %v1207_v47, %v444_v31  ;;  %v469_v34 = vsub.f32 %v1211_v48, %v438_v32 }
 0x1a5   : > { %v1241_v35 = vpop.eup %854  ;;  %868 = vpow2.f32 %v489_v30 }
 0x1a6   : > { %v1243_v36 = vpop.eup %856  ;;  %v491_v37 = vmul.f32 1.442695, %v472_v33  ;;  %v485_v38 = vmul.f32 1.442695, %v469_v34 }
 0x1a7   : > { %539 = vadd.xlane.f32.xlu0 %v1241_v35  ;;  %533 = vadd.xlane.f32.xlu1 %v1243_v36  ;;  %v440_v39 = vpop.xlane.xlu0 %439 }
 0x1a8   : > { %870 = vpow2.f32 %v491_v37  ;;  %v470_v40 = vsub.f32 %v1217_v49, %v440_v39 }
 0x1a9   : > { %v1248_v41 = vpop.eup %858  ;;  %872 = vpow2.f32 %v485_v38 }
 0x1aa   : > { %v1250_v42 = vpop.eup %860  ;;  %v487_v43 = vmul.f32 1.442695, %v470_v40 }
 0x1ab   : > { %535 = vadd.xlane.f32.xlu0 %v1248_v41  ;;  %529 = vadd.xlane.f32.xlu1 %v1250_v42 }
 0x1ac   : > { %874 = vpow2.f32 %v487_v43 }
 0x1ad   : > { %v1254_v44 = vpop.eup %862 }
 0x1ae   : > { %v1256_v45 = vpop.eup %864 }
 0x1af   : > { %531 = vadd.xlane.f32.xlu0 %v1254_v44  ;;  %525 = vadd.xlane.f32.xlu1 %v1256_v45 }
 0x1b1   : > { %v1260_v46 = vpop.eup %866 }
 0x1b2   : > { %v1262_v47 = vpop.eup %868 }
 0x1b3   : > { %527 = vadd.xlane.f32.xlu0 %v1260_v46  ;;  %521 = vadd.xlane.f32.xlu1 %v1262_v47 }
 0x1b5   : > { %v1266_v48 = vpop.eup %870 }
 0x1b6   : > { %v1268_v49 = vpop.eup %872 }
 0x1b7   : > { %523 = vadd.xlane.f32.xlu0 %v1266_v48  ;;  %517 = vadd.xlane.f32.xlu1 %v1268_v49 }
 0x1b9   : > { %v1272_v50 = vpop.eup %874 }
 0x1bb   : > { %519 = vadd.xlane.f32.xlu0 %v1272_v50 }
 0x223   : > { %v546_v51 = vpop.xlane.xlu1 %545 }
 0x224   : > { %876 = vrcp.f32 %v546_v51 }
 0x227   : > { %v548_v52 = vpop.xlane.xlu0 %547 }
 0x228   : > { %878 = vrcp.f32 %v548_v52  ;;  %v542_v53 = vpop.xlane.xlu1 %541 }
 0x229   : > { %880 = vrcp.f32 %v542_v53 }
 0x22c   : > { %v544_v54 = vpop.xlane.xlu0 %543  ;;  %v538_v55 = vpop.xlane.xlu1 %537 }
 0x22d   : > { %882 = vrcp.f32 %v544_v54 }
 0x22e   : > { %884 = vrcp.f32 %v538_v55 }
 0x230   : > { %v540_v56 = vpop.xlane.xlu0 %539  ;;  %v534_v60 = vpop.xlane.xlu1 %533 }
 0x231   : > { %886 = vrcp.f32 %v540_v56  ;;  %v877_v57 = vpop.eup %876 }
 0x232   : > { %v579_v61 = vmul.f32 %v877_v57, %v1220_v12 }
 0x234   : > { %v536_v58 = vpop.xlane.xlu0 %535  ;;  %v530_v6 = vpop.xlane.xlu1 %529 }
 0x235   : > { %v879_v59 = vpop.eup %878  ;;  %888 = vrcp.f32 %v536_v58 }
 0x236   : > { %v580_v62 = vmul.f32 %v879_v59, %v1225_v19  ;;  %v881_v63 = vpop.eup %880  ;;  %890 = vrcp.f32 %v534_v60 }
 0x237   : > { %v577_v3 = vmul.f32 %v881_v63, %v1227_v20 }
 0x238   : > { %v588_v0 = vpack.c.bf16 %v580_v62, %v579_v61  ;;  %v532_v2 = vpop.xlane.xlu0 %531  ;;  %v526_v16 = vpop.xlane.xlu1 %525 }
 0x239   : > { %892 = vrcp.f32 %v532_v2 }
 0x23a   : > { %v883_v1 = vpop.eup %882  ;;  %780 = vmatprep.subr.bf16.mxu1 %v588_v0  ;;  %894 = vrcp.f32 %v530_v6 }
 0x23b   : > { %781 = vmatpush3.bf16.xpose.msra.mxu1 %v588_v0  ;;  %v578_v4 = vmul.f32 %v883_v1, %v1235_v28  ;;  %v885_v5 = vpop.eup %884 }
 0x23c   : > { %v575_v11 = vmul.f32 %v885_v5, %v1233_v27  ;;  %v528_v14 = vpop.xlane.xlu0 %527  ;;  %v522_v23 = vpop.xlane.xlu1 %521 }
 0x23d   : > { %v587_v7 = vpack.c.bf16 %v578_v4, %v577_v3  ;;  %896 = vrcp.f32 %v528_v14 }
 0x23e   : > { %v887_v9 = vpop.eup %886  ;;  %898 = vrcp.f32 %v526_v16 }
 0x23f   : > { %782 = vmatprep.subr.bf16.mxu1 %v587_v7  ;;  %v576_v10 = vmul.f32 %v887_v9, %v1241_v35 }
 0x240   : > { %v524_v21 = vpop.xlane.xlu0 %523  ;;  %v518_v30 = vpop.xlane.xlu1 %517 }
 0x241   : > { %v586_v12 = vpack.c.bf16 %v576_v10, %v575_v11  ;;  %900 = vrcp.f32 %v524_v21 }
 0x242   : > { %v889_v13 = vpop.eup %888  ;;  %902 = vrcp.f32 %v522_v23 }
 0x243   : > { %783 = vmatpush3.bf16.xpose.msra.mxu1 %v587_v7  ;;  %v891_v15 = vpop.eup %890  ;;  %v574_v17 = vmul.f32 %v889_v13, %v1248_v41 }
 0x244   : > { %784 = vmatprep.subr.bf16.mxu1 %v586_v12  ;;  %v573_v18 = vmul.f32 %v891_v15, %v1243_v36  ;;  %v520_v28 = vpop.xlane.xlu0 %519 }
 0x245   : > { %904 = vrcp.f32 %v520_v28 }
 0x246   : > { %v585_v19 = vpack.c.bf16 %v574_v17, %v573_v18  ;;  %v893_v20 = vpop.eup %892  ;;  %906 = vrcp.f32 %v518_v30 }
 0x247   : > { %v895_v22 = vpop.eup %894  ;;  %v572_v24 = vmul.f32 %v893_v20, %v1254_v44 }
 0x248   : > { %v571_v25 = vmul.f32 %v895_v22, %v1250_v42 }
 0x24a   : > { %v584_v26 = vpack.c.bf16 %v572_v24, %v571_v25  ;;  %v897_v27 = vpop.eup %896 }
 0x24b   : > { %785 = vmatpush3.bf16.xpose.msra.mxu1 %v586_v12  ;;  %v899_v29 = vpop.eup %898  ;;  %v570_v31 = vmul.f32 %v897_v27, %v1260_v46 }
 0x24c   : > { %786 = vmatprep.subr.bf16.mxu1 %v585_v19  ;;  %v569_v32 = vmul.f32 %v899_v29, %v1256_v45 }
 0x24e   : > { %v583_v33 = vpack.c.bf16 %v570_v31, %v569_v32  ;;  %v901_v34 = vpop.eup %900 }
 0x24f   : > { %v903_v35 = vpop.eup %902  ;;  %v568_v36 = vmul.f32 %v901_v34, %v1266_v48 }
 0x250   : > { %v567_v37 = vmul.f32 %v903_v35, %v1262_v47 }
 0x252   : > { %v582_v38 = vpack.c.bf16 %v568_v36, %v567_v37  ;;  %v905_v39 = vpop.eup %904 }
 0x253   : > { %787 = vmatpush3.bf16.xpose.msra.mxu1 %v585_v19  ;;  %v907_v40 = vpop.eup %906  ;;  %v566_v41 = vmul.f32 %v905_v39, %v1272_v50 }
 0x254   : > { %788 = vmatprep.subr.bf16.mxu1 %v584_v26  ;;  %v565_v42 = vmul.f32 %v907_v40, %v1268_v49 }
 0x256   : > { %v581_v43 = vpack.c.bf16 %v566_v41, %v565_v42 }
 0x25b   : > { %789 = vmatpush3.bf16.xpose.msra.mxu1 %v584_v26 }
 0x25c   : > { %790 = vmatprep.subr.bf16.mxu1 %v583_v33 }
 0x263   : > { %791 = vmatpush3.bf16.xpose.msra.mxu1 %v583_v33 }
 0x264   : > { %792 = vmatprep.subr.bf16.mxu1 %v582_v38 }
 0x26b   : > { %793 = vmatpush3.bf16.xpose.msra.mxu1 %v582_v38 }
 0x26c   : > { %794 = vmatprep.subr.bf16.mxu1 %v581_v43 }
 0x273   : > { %795 = vmatpush3.bf16.xpose.msra.mxu1 %v581_v43 }
 0x27a   : > { %797 = vmatmul.mubr.bf16.vlgmr.msra.gmra.mxu1 %v1057_v8 }
 0x33a   : > { %v798_v44 = vpop.f32.mrf.mxu1 }
 0x33b   : > { %640 = vst [vmem:[%s163_s20 + $0x10] sm:$0xff] %v798_v44 }
 0x33c   : > { %v623_v45 = vpop.f32.mrf.mxu1 }
 0x33d   : > { %638 = vst [vmem:[%s163_s20] sm:$0xff] %v623_v45 }
 0x33e   : > { %v799_v46 = vpop.f32.mrf.mxu1 }
 0x33f   : > { %641 = vst [vmem:[%s163_s20 + $0x18] sm:$0xff] %v799_v46 }
 0x340   : > { %v626_v8 = vpop.f32.mrf.mxu1 }
 0x341   : > { %639 = vst [vmem:[%s163_s20 + $0x8] sm:$0xff] %v626_v8 }
 0x342   : > { %921 = shalt.err (!%p918_p3)
}
 0x343   : > { %s922_s6 = scalar_lea.hbm %s1299_s28, 512  ;;  %s926_s9 = scalar_lea.hbm %s1344_s3, 1024 }
 0x344   : > { %p923_p4 = scmp.ne.s32.totalorder %s1299_s28, %s922_s6  ;;  %p927_p9 = scmp.lt.s32.totalorder %s1299_s28, %s1344_s3 }
 0x345   : > { %p928_p10 = scmp.lt.s32.totalorder %s926_s9, %s922_s6 }
 0x346   : > { %p924_p7 = pnand %p923_p4, %p1032_p5 }
 0x347   : > { %p929_p11 = por %p928_p10, %p927_p9 }
 0x348   : > { %p925_p8 = pneg %p924_p7 }
 0x34a   : > { %p930_p12 = pnand %p929_p11, %p925_p8 }
 0x34c   : > { %933 = shalt.err (!%p930_p12)
}
 0x34d   : > { %s972_s17 = smov 128   ;;  %s973_s19 = smov 8  }
 0x34e   : > { %800 = dma.vmem_to_hbm [thread:$0]  (%p1032_p5), %s1294_s24, 512, %s1299_s28, %s1301_s29, %s972_s17, %s972_s17, %s973_s19  }
 0x34f PF: > { %p806_p13 = scmp.ge.s32.totalorder %s968_s15, 2  ;;  %s671_s20 = sand.u32 1, %s956_s12  }
 0x350   : > { %s672_s25 = scalar_lea.sflag [#allocation3], %s671_s20 }
 0x351   : > { %p803_p0 = pnand %p806_p13, %p1036_p6 }
 0x353   : > { %p804_p1 = pneg %p803_p0 }
 0x355   : > { %951 = dma.done.wait (%p804_p1), %s672_s25, 512  }
 0x356   : > { %953 = vsyncadd (%p804_p1), %s672_s25, 4294966784  ;;  %p13_p2 = scmp.ge.s32.totalorder %s1019_s18, 4   ;;  %s1347_s12 = smov %s960_s13 }
 0x357   : > { %s1348_s13 = smov %s964_s14  ;;  %s1349_s14 = smov %s1030_s21 }
 0x358   : > { %s1350_s15 = smov %s1019_s18  ;;  %15 = sbr.rel (!%p13_p2) target bundleno = 3 (0x3), region = 67 }
 0x35d   :  { %677 = vsyncpa [#allocation3], 1 }
 0x35e   :  { %679 = vsyncpa [#allocation3 + $0x1], 1 }

</bundles_post_ra>
